<compile_context>
chip_gen: v7x
topology: tpu7x:2x2x1
jax: 0.10.0
libtpu: 0.0.40
codegen_flags: <defaults>
</compile_context>

<pallas_src>
import functools

import jax
import jax.numpy as jnp
import numpy as np
from jax import lax
from jax.experimental import pallas as pl
from jax.experimental.pallas import tpu as pltpu


def _recurrent_block_kernel(x_ref, a_up_ref, a_mid_ref, a_dn_ref, b_ref,
                            out_ref, *, H, t):
    """One batch-block per grid step; tensors are lane-packed as (rows, W*C).

    x_ref    : (R, W*C)    R = (#images in block) * H rows, channels on lanes
    a_*_ref  : (W*C, W*C)  banded depthwise(+BN-folded 1x1) matrices for the
                           kh = -1 / 0 / +1 vertical tap rows
    b_ref    : (1, W*C)    total bias (depthwise bias @ 1x1 + BN shift), tiled
    out_ref  : (R, W*C)
    """
    R, WC = x_ref.shape
    x = x_ref[...]                                   # (R, WC)
    bias = b_ref[...]                                # (1, WC), broadcasts

    # Hoisted row masks: row h of an image uses rows h-1 / h+1 of the SAME
    # image; rows 0 and H-1 of each image (and hence every image boundary in
    # the packed batch) see zero padding instead.
    row_in_img = lax.broadcasted_iota(jnp.int32, (R, WC), 0) % H
    has_up = row_in_img > 0
    has_dn = row_in_img < H - 1

    def conv_one(v):
        """ConvOne: depthwise 3x3 (pad=1) -> 1x1 conv (+folded BN) -> ReLU."""
        # kh = -1 / +1 neighbour rows via sublane rotation (XLU) + masks;
        # positive shifts only (R-1 == roll by -1 for a rotation).
        up = jnp.where(has_up, pltpu.roll(v, shift=1, axis=0), 0.0)
        dn = jnp.where(has_dn, pltpu.roll(v, shift=R - 1, axis=0), 0.0)
        # Horizontal taps + 1x1 + BN are folded into the banded matrices:
        # three (R,128)@(128,128) MXU matmuls, weights loaded at point of use
        # to keep vreg live ranges short.
        acc = jnp.dot(up, a_up_ref[...], preferred_element_type=jnp.float32)
        acc = acc + jnp.dot(v, a_mid_ref[...], preferred_element_type=jnp.float32)
        acc = acc + jnp.dot(dn, a_dn_ref[...], preferred_element_type=jnp.float32)
        return jnp.maximum(acc + bias, 0.0)

    # RecurrentBlock recurrence (mirrors the torch loop exactly)
    y = x
    for i in range(t):
        if i == 0:
            y = conv_one(x)
        y = conv_one(x + y)

    out_ref[...] = y


def _num_batch_blocks(N):
    """2-way 'parallel' batch split only on multi-TensorCore chips (v7x)."""
    try:
        kind = jax.devices()[0].device_kind.lower()
    except Exception:
        kind = ""
    if N % 2 == 0 and ("v7" in kind or "7x" in kind):
        return 2
    return 1


def recurrent_block_forward(x_nhwc, params, t=2):
    """x_nhwc: (N, H, W, C) float32 (NHWC, in_channels == out_channels == C)."""
    N, H, W, C = x_nhwc.shape
    WC = W * C
    x = x_nhwc.reshape(N * H, WC)            # contiguous lane-dense packing

    G = _num_batch_blocks(N)                 # 1 on v5e/v6e, 2 on v7x
    rows = (N // G) * H                      # rows per grid step
    assert rows % 8 == 0 and WC % 128 == 0, "block must be (8,128)-aligned"

    kernel = functools.partial(_recurrent_block_kernel, H=H, t=t)

    grid_spec = pltpu.PrefetchScalarGridSpec(
        num_scalar_prefetch=0,
        grid=(G,),
        in_specs=[
            pl.BlockSpec((rows, WC), lambda g: (g, 0)),   # packed input rows
            pl.BlockSpec((WC, WC), lambda g: (0, 0)),     # A_up  (kh = -1)
            pl.BlockSpec((WC, WC), lambda g: (0, 0)),     # A_mid (kh =  0)
            pl.BlockSpec((WC, WC), lambda g: (0, 0)),     # A_dn  (kh = +1)
            pl.BlockSpec((1, WC), lambda g: (0, 0)),      # folded total bias
        ],
        out_specs=pl.BlockSpec((rows, WC), lambda g: (g, 0)),
    )

    out = pl.pallas_call(
        kernel,
        out_shape=jax.ShapeDtypeStruct((N * H, WC), jnp.float32),
        grid_spec=grid_spec,
        compiler_params=pltpu.CompilerParams(dimension_semantics=("parallel",)),
    )(x, params["A_up"], params["A_mid"], params["A_dn"], params["b_total"])
    return out.reshape(N, H, W, C)


def init_params(key, C, W):
    """Deterministic synthetic parameters matching the torch module's shapes,
    with BatchNorm (inference mode) folded into the 1x1-conv weight/bias and
    the depthwise+1x1 convs pre-folded into banded (W*C, W*C) matrices."""
    eps = 1e-5
    ks = jax.random.split(key, 8)

    # depthwise conv: torch weight (C, 1, 3, 3) [groups=C], bias (C,)
    dw_w_t = jax.random.normal(ks[0], (C, 1, 3, 3), jnp.float32) * 0.5
    dw_b = jax.random.normal(ks[1], (C,), jnp.float32) * 0.1
    # pointwise conv: torch weight (C, C, 1, 1), bias (C,)
    pw_w_t = jax.random.normal(ks[2], (C, C, 1, 1), jnp.float32) * 0.2
    pw_b = jax.random.normal(ks[3], (C,), jnp.float32) * 0.1
    # BatchNorm2d running stats / affine params
    gamma = 1.0 + 0.1 * jax.random.normal(ks[4], (C,), jnp.float32)
    beta = 0.1 * jax.random.normal(ks[5], (C,), jnp.float32)
    rmean = 0.1 * jax.random.normal(ks[6], (C,), jnp.float32)
    rvar = jax.random.uniform(ks[7], (C,), jnp.float32, minval=0.5, maxval=1.5)

    scale = gamma / jnp.sqrt(rvar + eps)
    pw_eff = pw_w_t[:, :, 0, 0].T * scale            # (Cin, Cout), BN scale folded
    pw_b_eff = (pw_b - rmean) * scale + beta         # (Cout,)
    dw_hwc = jnp.transpose(dw_w_t[:, 0], (1, 2, 0))  # (3, 3, C)

    # Banded matrices: A_kh[w'*C+c, w*C+o] = K[kh, kw, c] * pw_eff[c, o] with
    # input pixel w' = w + kw - 1 (i.e. kw = 1 - (w - w')); zero elsewhere.
    WC = W * C
    A = []
    for kh in range(3):
        Akh = jnp.zeros((WC, WC), jnp.float32)
        for dw in (-1, 0, 1):                        # dw = w_out - w_in
            kw = 1 - dw
            blk = dw_hwc[kh, kw][:, None] * pw_eff   # diag(K[kh,kw]) @ pw_eff
            Akh = Akh + jnp.kron(jnp.eye(W, k=dw, dtype=jnp.float32), blk)
        A.append(Akh)
    b_total = jnp.tile(dw_b @ pw_eff + pw_b_eff, W)[None, :]   # (1, W*C)

    return {
        # kernel-side, lane-packed parameters
        "A_up": A[0], "A_mid": A[1], "A_dn": A[2], "b_total": b_total,
        # reference-side parameters
        "dw_hwio": dw_hwc[:, :, None, :],            # (3, 3, 1, C)
        "dw_b": dw_b,
        "pw_eff": pw_eff,
        "pw_b_eff": pw_b_eff,
    }


def _conv_one_ref(a, p):
    """Pure-JAX ConvOne (lax.conv depthwise + 1x1 + folded BN + ReLU), NHWC."""
    C = a.shape[-1]
    d = lax.conv_general_dilated(
        a, p["dw_hwio"], window_strides=(1, 1), padding=[(1, 1), (1, 1)],
        dimension_numbers=("NHWC", "HWIO", "NHWC"),
        feature_group_count=C,
        precision=lax.Precision.HIGHEST) + p["dw_b"]
    y = jnp.einsum("nhwc,co->nhwo", d, p["pw_eff"],
                   precision=lax.Precision.HIGHEST) + p["pw_b_eff"]
    return jnp.maximum(y, 0.0)


def ref_forward(x, p, t=2):
    """Pure-JAX RecurrentBlock reference, mirroring the torch loop."""
    y = x
    for i in range(t):
        if i == 0:
            y = _conv_one_ref(x, p)
        y = _conv_one_ref(x + y, p)
    return y


if __name__ == "__main__":
    # in_channels == out_channels is required by the module's x + conv(x) add;
    # C=8, W=16 makes the packed lane width exactly 128 (lane-dense).
    N, C, H, W, t = 2, 8, 16, 16, 2
    key = jax.random.PRNGKey(0)
    kx, kp = jax.random.split(key)

    # equivalent of a torch input (N, C, H, W) = (2, 8, 16, 16), here as NHWC
    x = jax.random.normal(kx, (N, H, W, C), jnp.float32)
    params = init_params(kp, C, W)

    out = recurrent_block_forward(x, params, t=t)
    out = jax.block_until_ready(out)
    assert out.shape == (N, H, W, C)

    ref = ref_forward(x, params, t=t)
    np.testing.assert_allclose(np.asarray(out), np.asarray(ref),
                               rtol=2e-3, atol=2e-3)
    print("KERNEL_OK")
</pallas_src>

<mosaic_0001>
module attributes {stable_mosaic.version = 11 : i64} {
  func.func @_recurrent_block_kernel(%arg0: i32, %arg1: memref<32x128xf32, #tpu.memory_space<vmem>>, %arg2: memref<128x128xf32, #tpu.memory_space<vmem>>, %arg3: memref<128x128xf32, #tpu.memory_space<vmem>>, %arg4: memref<128x128xf32, #tpu.memory_space<vmem>>, %arg5: memref<1x128xf32, #tpu.memory_space<vmem>>, %arg6: memref<32x128xf32, #tpu.memory_space<vmem>>) attributes {dimension_semantics = [#tpu.dimension_semantics<parallel>], iteration_bounds = array<i64: 1>, scalar_prefetch = 0 : i64, scratch_operands = 0 : i64, tpu.core_type = #tpu.core_type<tc>, window_params = [{transform_indices = @transform_0, window_bounds = array<i64: 32, 128>}, {pipeline_mode = #tpu.pipeline_mode<synchronous>, transform_indices = @transform_1, window_bounds = array<i64: 128, 128>}, {pipeline_mode = #tpu.pipeline_mode<synchronous>, transform_indices = @transform_2, window_bounds = array<i64: 128, 128>}, {pipeline_mode = #tpu.pipeline_mode<synchronous>, transform_indices = @transform_3, window_bounds = array<i64: 128, 128>}, {pipeline_mode = #tpu.pipeline_mode<synchronous>, transform_indices = @transform_4, window_bounds = array<i64: 1, 128>}, {transform_indices = @transform_5, window_bounds = array<i64: 32, 128>}]} {
    %c0 = arith.constant 0 : index
    %c0_0 = arith.constant 0 : index
    %0 = vector.load %arg1[%c0, %c0_0] : memref<32x128xf32, #tpu.memory_space<vmem>>, vector<32x128xf32>
    %c0_1 = arith.constant 0 : index
    %c0_2 = arith.constant 0 : index
    %1 = vector.load %arg5[%c0_1, %c0_2] : memref<1x128xf32, #tpu.memory_space<vmem>>, vector<1x128xf32>
    %2 = tpu.iota {dimensions = array<i32: 0>} : vector<32x128xi32>
    %c16_i32 = arith.constant 16 : i32
    %c0_i32 = arith.constant 0 : i32
    %3 = arith.cmpi eq, %c16_i32, %c0_i32 : i32
    %c1_i32 = arith.constant 1 : i32
    %4 = arith.select %3, %c1_i32, %c16_i32 : i32
    %5 = vector.broadcast %4 : i32 to vector<32x128xi32>
    %6 = arith.remsi %2, %5 : vector<32x128xi32>
    %c0_i32_3 = arith.constant 0 : i32
    %7 = vector.broadcast %c0_i32_3 : i32 to vector<32x128xi32>
    %8 = arith.cmpi ne, %6, %7 : vector<32x128xi32>
    %c0_i32_4 = arith.constant 0 : i32
    %9 = vector.broadcast %c0_i32_4 : i32 to vector<32x128xi32>
    %10 = arith.cmpi slt, %6, %9 : vector<32x128xi32>
    %c0_i32_5 = arith.constant 0 : i32
    %11 = arith.cmpi slt, %4, %c0_i32_5 : i32
    %12 = vector.broadcast %11 : i1 to vector<32x128xi1>
    %13 = vector.broadcast %12 : vector<32x128xi1> to vector<32x128xi1>
    %14 = arith.xori %10, %13 : vector<32x128xi1>
    %15 = arith.andi %14, %8 : vector<32x128xi1>
    %16 = vector.broadcast %4 : i32 to vector<32x128xi32>
    %17 = arith.addi %6, %16 : vector<32x128xi32>
    %18 = arith.select %15, %17, %6 : vector<32x128xi1>, vector<32x128xi32>
    %c0_i32_6 = arith.constant 0 : i32
    %19 = vector.broadcast %c0_i32_6 : i32 to vector<32x128xi32>
    %20 = arith.cmpi sgt, %18, %19 : vector<32x128xi32>
    %c15_i32 = arith.constant 15 : i32
    %21 = vector.broadcast %c15_i32 : i32 to vector<32x128xi32>
    %22 = arith.cmpi slt, %18, %21 : vector<32x128xi32>
    %c1_i32_7 = arith.constant 1 : i32
    %23 = tpu.dynamic_rotate %0 by %c1_i32_7 dim 0 : vector<32x128xf32>, i32 -> vector<32x128xf32>
    %cst = arith.constant 0.000000e+00 : f32
    %24 = vector.broadcast %cst : f32 to vector<32x128xf32>
    %25 = arith.select %20, %23, %24 : vector<32x128xi1>, vector<32x128xf32>
    %c31_i32 = arith.constant 31 : i32
    %26 = tpu.dynamic_rotate %0 by %c31_i32 dim 0 : vector<32x128xf32>, i32 -> vector<32x128xf32>
    %cst_8 = arith.constant 0.000000e+00 : f32
    %27 = vector.broadcast %cst_8 : f32 to vector<32x128xf32>
    %28 = arith.select %22, %26, %27 : vector<32x128xi1>, vector<32x128xf32>
    %c0_9 = arith.constant 0 : index
    %c0_10 = arith.constant 0 : index
    %29 = vector.load %arg2[%c0_9, %c0_10] : memref<128x128xf32, #tpu.memory_space<vmem>>, vector<128x128xf32>
    %cst_11 = arith.constant dense<0.000000e+00> : vector<32x128xf32>
    %30 = tpu.matmul %25, %29, %cst_11 {dimension_numbers = #tpu.dot_dimension_numbers<[1], [0], [0], [1], [0, 0, 1, 1], [], []>} : vector<32x128xf32>, vector<128x128xf32>, vector<32x128xf32> -> vector<32x128xf32>
    %c0_12 = arith.constant 0 : index
    %c0_13 = arith.constant 0 : index
    %31 = vector.load %arg3[%c0_12, %c0_13] : memref<128x128xf32, #tpu.memory_space<vmem>>, vector<128x128xf32>
    %cst_14 = arith.constant dense<0.000000e+00> : vector<32x128xf32>
    %32 = tpu.matmul %0, %31, %cst_14 {dimension_numbers = #tpu.dot_dimension_numbers<[1], [0], [0], [1], [0, 0, 1, 1], [], []>} : vector<32x128xf32>, vector<128x128xf32>, vector<32x128xf32> -> vector<32x128xf32>
    %33 = arith.addf %30, %32 : vector<32x128xf32>
    %c0_15 = arith.constant 0 : index
    %c0_16 = arith.constant 0 : index
    %34 = vector.load %arg4[%c0_15, %c0_16] : memref<128x128xf32, #tpu.memory_space<vmem>>, vector<128x128xf32>
    %cst_17 = arith.constant dense<0.000000e+00> : vector<32x128xf32>
    %35 = tpu.matmul %28, %34, %cst_17 {dimension_numbers = #tpu.dot_dimension_numbers<[1], [0], [0], [1], [0, 0, 1, 1], [], []>} : vector<32x128xf32>, vector<128x128xf32>, vector<32x128xf32> -> vector<32x128xf32>
    %36 = arith.addf %33, %35 : vector<32x128xf32>
    %37 = vector.broadcast %1 : vector<1x128xf32> to vector<32x128xf32>
    %38 = arith.addf %36, %37 : vector<32x128xf32>
    %cst_18 = arith.constant 0.000000e+00 : f32
    %39 = vector.broadcast %cst_18 : f32 to vector<32x128xf32>
    %40 = arith.maximumf %38, %39 : vector<32x128xf32>
    %41 = arith.addf %0, %40 : vector<32x128xf32>
    %c1_i32_19 = arith.constant 1 : i32
    %42 = tpu.dynamic_rotate %41 by %c1_i32_19 dim 0 : vector<32x128xf32>, i32 -> vector<32x128xf32>
    %cst_20 = arith.constant 0.000000e+00 : f32
    %43 = vector.broadcast %cst_20 : f32 to vector<32x128xf32>
    %44 = arith.select %20, %42, %43 : vector<32x128xi1>, vector<32x128xf32>
    %c31_i32_21 = arith.constant 31 : i32
    %45 = tpu.dynamic_rotate %41 by %c31_i32_21 dim 0 : vector<32x128xf32>, i32 -> vector<32x128xf32>
    %cst_22 = arith.constant 0.000000e+00 : f32
    %46 = vector.broadcast %cst_22 : f32 to vector<32x128xf32>
    %47 = arith.select %22, %45, %46 : vector<32x128xi1>, vector<32x128xf32>
    %c0_23 = arith.constant 0 : index
    %c0_24 = arith.constant 0 : index
    %48 = vector.load %arg2[%c0_23, %c0_24] : memref<128x128xf32, #tpu.memory_space<vmem>>, vector<128x128xf32>
    %cst_25 = arith.constant dense<0.000000e+00> : vector<32x128xf32>
    %49 = tpu.matmul %44, %48, %cst_25 {dimension_numbers = #tpu.dot_dimension_numbers<[1], [0], [0], [1], [0, 0, 1, 1], [], []>} : vector<32x128xf32>, vector<128x128xf32>, vector<32x128xf32> -> vector<32x128xf32>
    %c0_26 = arith.constant 0 : index
    %c0_27 = arith.constant 0 : index
    %50 = vector.load %arg3[%c0_26, %c0_27] : memref<128x128xf32, #tpu.memory_space<vmem>>, vector<128x128xf32>
    %cst_28 = arith.constant dense<0.000000e+00> : vector<32x128xf32>
    %51 = tpu.matmul %41, %50, %cst_28 {dimension_numbers = #tpu.dot_dimension_numbers<[1], [0], [0], [1], [0, 0, 1, 1], [], []>} : vector<32x128xf32>, vector<128x128xf32>, vector<32x128xf32> -> vector<32x128xf32>
    %52 = arith.addf %49, %51 : vector<32x128xf32>
    %c0_29 = arith.constant 0 : index
    %c0_30 = arith.constant 0 : index
    %53 = vector.load %arg4[%c0_29, %c0_30] : memref<128x128xf32, #tpu.memory_space<vmem>>, vector<128x128xf32>
    %cst_31 = arith.constant dense<0.000000e+00> : vector<32x128xf32>
    %54 = tpu.matmul %47, %53, %cst_31 {dimension_numbers = #tpu.dot_dimension_numbers<[1], [0], [0], [1], [0, 0, 1, 1], [], []>} : vector<32x128xf32>, vector<128x128xf32>, vector<32x128xf32> -> vector<32x128xf32>
    %55 = arith.addf %52, %54 : vector<32x128xf32>
    %56 = vector.broadcast %1 : vector<1x128xf32> to vector<32x128xf32>
    %57 = arith.addf %55, %56 : vector<32x128xf32>
    %cst_32 = arith.constant 0.000000e+00 : f32
    %58 = vector.broadcast %cst_32 : f32 to vector<32x128xf32>
    %59 = arith.maximumf %57, %58 : vector<32x128xf32>
    %60 = arith.addf %0, %59 : vector<32x128xf32>
    %c1_i32_33 = arith.constant 1 : i32
    %61 = tpu.dynamic_rotate %60 by %c1_i32_33 dim 0 : vector<32x128xf32>, i32 -> vector<32x128xf32>
    %cst_34 = arith.constant 0.000000e+00 : f32
    %62 = vector.broadcast %cst_34 : f32 to vector<32x128xf32>
    %63 = arith.select %20, %61, %62 : vector<32x128xi1>, vector<32x128xf32>
    %c31_i32_35 = arith.constant 31 : i32
    %64 = tpu.dynamic_rotate %60 by %c31_i32_35 dim 0 : vector<32x128xf32>, i32 -> vector<32x128xf32>
    %cst_36 = arith.constant 0.000000e+00 : f32
    %65 = vector.broadcast %cst_36 : f32 to vector<32x128xf32>
    %66 = arith.select %22, %64, %65 : vector<32x128xi1>, vector<32x128xf32>
    %c0_37 = arith.constant 0 : index
    %c0_38 = arith.constant 0 : index
    %67 = vector.load %arg2[%c0_37, %c0_38] : memref<128x128xf32, #tpu.memory_space<vmem>>, vector<128x128xf32>
    %cst_39 = arith.constant dense<0.000000e+00> : vector<32x128xf32>
    %68 = tpu.matmul %63, %67, %cst_39 {dimension_numbers = #tpu.dot_dimension_numbers<[1], [0], [0], [1], [0, 0, 1, 1], [], []>} : vector<32x128xf32>, vector<128x128xf32>, vector<32x128xf32> -> vector<32x128xf32>
    %c0_40 = arith.constant 0 : index
    %c0_41 = arith.constant 0 : index
    %69 = vector.load %arg3[%c0_40, %c0_41] : memref<128x128xf32, #tpu.memory_space<vmem>>, vector<128x128xf32>
    %cst_42 = arith.constant dense<0.000000e+00> : vector<32x128xf32>
    %70 = tpu.matmul %60, %69, %cst_42 {dimension_numbers = #tpu.dot_dimension_numbers<[1], [0], [0], [1], [0, 0, 1, 1], [], []>} : vector<32x128xf32>, vector<128x128xf32>, vector<32x128xf32> -> vector<32x128xf32>
    %71 = arith.addf %68, %70 : vector<32x128xf32>
    %c0_43 = arith.constant 0 : index
    %c0_44 = arith.constant 0 : index
    %72 = vector.load %arg4[%c0_43, %c0_44] : memref<128x128xf32, #tpu.memory_space<vmem>>, vector<128x128xf32>
    %cst_45 = arith.constant dense<0.000000e+00> : vector<32x128xf32>
    %73 = tpu.matmul %66, %72, %cst_45 {dimension_numbers = #tpu.dot_dimension_numbers<[1], [0], [0], [1], [0, 0, 1, 1], [], []>} : vector<32x128xf32>, vector<128x128xf32>, vector<32x128xf32> -> vector<32x128xf32>
    %74 = arith.addf %71, %73 : vector<32x128xf32>
    %75 = vector.broadcast %1 : vector<1x128xf32> to vector<32x128xf32>
    %76 = arith.addf %74, %75 : vector<32x128xf32>
    %cst_46 = arith.constant 0.000000e+00 : f32
    %77 = vector.broadcast %cst_46 : f32 to vector<32x128xf32>
    %78 = arith.maximumf %76, %77 : vector<32x128xf32>
    %c0_47 = arith.constant 0 : index
    %c0_48 = arith.constant 0 : index
    %79 = vector.load %arg6[%c0_47, %c0_48] : memref<32x128xf32, #tpu.memory_space<vmem>>, vector<32x128xf32>
    tpu.vector_store %arg6[%c0_47, %c0_48], %78 {strides = array<i32>} : memref<32x128xf32, #tpu.memory_space<vmem>>, vector<32x128xf32>,
    return
  }
  func.func @transform_0(%arg0: i32) -> (i32, i32) {
    %c0_i32 = arith.constant 0 : i32
    %c0_i32_0 = arith.constant 0 : i32
    return %arg0, %c0_i32 : i32, i32
  }
  func.func @transform_1(%arg0: i32) -> (i32, i32) {
    %c0_i32 = arith.constant 0 : i32
    %c0_i32_0 = arith.constant 0 : i32
    %c0_i32_1 = arith.constant 0 : i32
    return %c0_i32, %c0_i32_0 : i32, i32
  }
  func.func @transform_2(%arg0: i32) -> (i32, i32) {
    %c0_i32 = arith.constant 0 : i32
    %c0_i32_0 = arith.constant 0 : i32
    %c0_i32_1 = arith.constant 0 : i32
    return %c0_i32, %c0_i32_0 : i32, i32
  }
  func.func @transform_3(%arg0: i32) -> (i32, i32) {
    %c0_i32 = arith.constant 0 : i32
    %c0_i32_0 = arith.constant 0 : i32
    %c0_i32_1 = arith.constant 0 : i32
    return %c0_i32, %c0_i32_0 : i32, i32
  }
  func.func @transform_4(%arg0: i32) -> (i32, i32) {
    %c0_i32 = arith.constant 0 : i32
    %c0_i32_0 = arith.constant 0 : i32
    %c0_i32_1 = arith.constant 0 : i32
    return %c0_i32, %c0_i32_0 : i32, i32
  }
  func.func @transform_5(%arg0: i32) -> (i32, i32) {
    %c0_i32 = arith.constant 0 : i32
    %c0_i32_0 = arith.constant 0 : i32
    return %arg0, %c0_i32 : i32, i32
  }
}

</mosaic_0001>

<bundles_post_ra>
// kernel: tpu_custom_call.1
= control target key start
LH: loop header
LB: loop body
LE: loop exit
PB: predicated region body
PF: predicated region fallthrough
CT: control target
= control target key end

     0   :  { %10 = vsyncpa [#allocation3], 0  ;;  %s2581_s0 = inlined_call_operand.hbm [shape: f32[32,128], index: 0, kind: input, shape index: {}]   ;;  %s2582_s1 = inlined_call_operand.hbm [shape: f32[128,128], index: 1, kind: input, shape index: {}]   ;;  %s2583_s2 = inlined_call_operand.hbm [shape: f32[128,128], index: 2, kind: input, shape index: {}]   ;;  %s2584_s3 = inlined_call_operand.hbm [shape: f32[128,128], index: 3, kind: input, shape index: {}]   ;;  %s2585_s4 = inlined_call_operand.vmem [shape: f32[1,128], index: 4, kind: input, shape index: {}]   ;;  %s2586_s5 = inlined_call_operand.hbm [shape: f32[32,128], index: 5, kind: output, shape index: {}]  }
   0x1   :  { %11 = vsyncpa [#allocation6], 0 }
   0x2   :  { %12 = vsyncpa [#allocation9], 0 }
   0x3   :  { %13 = vsyncpa [#allocation4], 0  ;;  %s2090_s18 = smov [#allocation5]   ;;  %s2091_s20 = smov [#allocation2]  }
   0x4   :  { %s31_s19 = sshll.u32 %s2090_s18, 4  ;;  %s19_s21 = sshll.u32 %s2091_s20, 4  ;;  %s32_s19 = int_to_ptr.vmem [resolvable:$true] %s31_s19  ;;  %s2127_s21 = int_to_ptr.vmem [resolvable:$true] %s19_s21 }
   0x5   :  { %s1972_s24 = scalar_lea.hbm %s2582_s1, 2048 }
   0x6   :  { %p1973_p0 = scmp.ne.s32.totalorder %s2582_s1, %s1972_s24  ;;  %p1976_p1 = scmp.lt.u32.totalorder %s1972_s24, %s2582_s1 }
   0x8   :  { %p1978_p2 = pnand %p1976_p1, %p1973_p0 }
   0xa   :  { %1981 = shalt.err (!%p1978_p2)
}
   0xb   :  { %s1982_s29 = scalar_lea.vmem %s32_s19, 2048  ;;  %p1987_p4 = scmp.lt.s32.totalorder %s32_s19, %s32_s19 }
   0xc   :  { %p1983_p3 = scmp.ne.s32.totalorder %s32_s19, %s1982_s29  ;;  %p1988_p5 = scmp.lt.s32.totalorder %s1982_s29, %s1982_s29 }
   0xe   :  { %p1989_p6 = por %p1988_p5, %p1987_p4 }
  0x10   :  { %p1990_p7 = pnand %p1989_p6, %p1983_p3 }
  0x12   :  { %1993 = shalt.err (!%p1990_p7)
}
  0x13   :  { %s2092_s30 = smov 128   ;;  %s2093_s6 = smov 8  }
  0x14   :  { %37 = dma.hbm_to_vmem [thread:$0]  %s2582_s1, 2048, %s32_s19, [#allocation6], %s2092_s30, %s2092_s30, %s2093_s6  }
  0x15   :  { %s1994_s11 = scalar_lea.hbm %s2581_s0, 512 }
  0x16   :  { %p1995_p8 = scmp.ne.s32.totalorder %s2581_s0, %s1994_s11  ;;  %p1998_p9 = scmp.lt.u32.totalorder %s1994_s11, %s2581_s0 }
  0x18   :  { %p2000_p10 = pnand %p1998_p9, %p1995_p8 }
  0x1a   :  { %2003 = shalt.err (!%p2000_p10)
}
  0x1b   :  { %s2004_s16 = scalar_lea.vmem %s2127_s21, 512  ;;  %p2009_p12 = scmp.lt.s32.totalorder %s2127_s21, %s2127_s21 }
  0x1c   :  { %p2005_p11 = scmp.ne.s32.totalorder %s2127_s21, %s2004_s16  ;;  %p2010_p13 = scmp.lt.s32.totalorder %s2004_s16, %s2004_s16 }
  0x1e   :  { %p2011_p0 = por %p2010_p13, %p2009_p12 }
  0x20   :  { %p2012_p1 = pnand %p2011_p0, %p2005_p11 }
  0x22   :  { %2015 = shalt.err (!%p2012_p1)
}
  0x23   :  { %25 = dma.hbm_to_vmem [thread:$0]  %s2581_s0, 512, %s2127_s21, [#allocation3], %s2092_s30, %s2092_s30, %s2093_s6  }
  0x24   :  { %s2094_s18 = smov [#allocation7]   ;;  %s2095_s20 = smov [#allocation8]  }
  0x25   :  { %s43_s19 = sshll.u32 %s2094_s18, 4  ;;  %s55_s22 = sshll.u32 %s2095_s20, 4  ;;  %s44_s19 = int_to_ptr.vmem [resolvable:$true] %s43_s19  ;;  %s2164_s22 = int_to_ptr.vmem [resolvable:$true] %s55_s22 }
  0x26   :  { %s2016_s25 = scalar_lea.hbm %s2583_s2, 2048 }
  0x27   :  { %p2017_p2 = scmp.ne.s32.totalorder %s2583_s2, %s2016_s25  ;;  %p2020_p3 = scmp.lt.u32.totalorder %s2016_s25, %s2583_s2 }
  0x29   :  { %p2022_p4 = pnand %p2020_p3, %p2017_p2 }
  0x2b   :  { %2025 = shalt.err (!%p2022_p4)
}
  0x2c   :  { %s2026_s0 = scalar_lea.vmem %s44_s19, 2048  ;;  %p2031_p6 = scmp.lt.s32.totalorder %s44_s19, %s44_s19 }
  0x2d   :  { %p2027_p5 = scmp.ne.s32.totalorder %s44_s19, %s2026_s0  ;;  %p2032_p7 = scmp.lt.s32.totalorder %s2026_s0, %s2026_s0 }
  0x2f   :  { %p2033_p8 = por %p2032_p7, %p2031_p6 }
  0x31   :  { %p2034_p9 = pnand %p2033_p8, %p2027_p5 }
  0x33   :  { %2037 = shalt.err (!%p2034_p9)
}
  0x34   :  { %49 = dma.hbm_to_vmem [thread:$0]  %s2583_s2, 2048, %s44_s19, [#allocation6], %s2092_s30, %s2092_s30, %s2093_s6  }
  0x35   :  { %s2038_s10 = scalar_lea.hbm %s2584_s3, 2048 }
  0x36   :  { %p2039_p10 = scmp.ne.s32.totalorder %s2584_s3, %s2038_s10  ;;  %p2042_p11 = scmp.lt.u32.totalorder %s2038_s10, %s2584_s3 }
  0x38   :  { %p2044_p12 = pnand %p2042_p11, %p2039_p10 }
  0x3a   :  { %2047 = shalt.err (!%p2044_p12)
}
  0x3b   :  { %s2048_s15 = scalar_lea.vmem %s2164_s22, 2048  ;;  %p2053_p0 = scmp.lt.s32.totalorder %s2164_s22, %s2164_s22 }
  0x3c   :  { %p2049_p13 = scmp.ne.s32.totalorder %s2164_s22, %s2048_s15  ;;  %p2054_p1 = scmp.lt.s32.totalorder %s2048_s15, %s2048_s15 }
  0x3e   :  { %p2055_p2 = por %p2054_p1, %p2053_p0 }
  0x40   :  { %p2056_p3 = pnand %p2055_p2, %p2049_p13 }
  0x42   :  { %2059 = shalt.err (!%p2056_p3)
}
  0x43   :  { %61 = dma.hbm_to_vmem [thread:$0]  %s2584_s3, 2048, %s2164_s22, [#allocation9], %s2092_s30, %s2092_s30, %s2093_s6  }
  0x44   :  { %2082 = dma.done.wait [#allocation3], 512  }
  0x45   :  { %2083 = vsyncadd [#allocation3], 4294966784 }
  0x46   :  { %2084 = dma.done.wait [#allocation6], 4096  }
  0x47   :  { %2085 = vsyncadd [#allocation6], 4294963200 }
  0x48   :  { %2086 = dma.done.wait [#allocation9], 2048  }
  0x49   :  { %2087 = vsyncadd [#allocation9], 4294965248  ;;  %v81_v0 = vlaneseq  ;;  %v168_v2 = vld [vmem:[#allocation5] sm:$0xff]  ;;  %v169_v3 = vld [vmem:[#allocation5 + $0x8] sm:$0xff] }
  0x4a   :  { %v170_v4 = vld [vmem:[#allocation5 + $0x10] sm:$0xff]  ;;  %v2203_v5 = vpack.c.bf16 %v169_v3, %v168_v2  ;;  %v171_v6 = vld [vmem:[#allocation5 + $0x18] sm:$0xff]  ;;  %v172_v8 = vld [vmem:[#allocation5 + $0x20] sm:$0xff] }
  0x4b   :  { %v2201_v1 = vshrl.u32 %v81_v0, 7  ;;  %v2205_v7 = vpack.c.bf16 %v171_v6, %v170_v4  ;;  %v173_v9 = vld [vmem:[#allocation5 + $0x28] sm:$0xff]  ;;  %v174_v12 = vld [vmem:[#allocation5 + $0x30] sm:$0xff]  ;;  %v184_v13 = vld [vmem:[#allocation7] sm:$0xff] }
  0x4c   :  { %1670 = vmatprep.subr.bf16.mxu0 %v2203_v5  ;;  %v2211_v11 = vpack.c.bf16 %v173_v9, %v172_v8  ;;  %v185_v14 = vld [vmem:[#allocation7 + $0x8] sm:$0xff]  ;;  %v175_v15 = vld [vmem:[#allocation5 + $0x38] sm:$0xff]  ;;  %v2215_v17 = vld [vmem:[#allocation2] sm:$0xff] }
  0x4d   :  { %v90_v10 = vand.u32 15, %v2201_v1  ;;  %1672 = vmatpush3.bf16.msra.mxu0 %v2203_v5  ;;  %v2213_v16 = vpack.c.bf16 %v185_v14, %v184_v13  ;;  %v2217_v18 = vld [vmem:[#allocation2 + $0x18] sm:$0xff]  ;;  %vm146_vm0 = vcmp.lt.s32.totalorder %v2201_v1, 1  ;;  %v142_v20 = vrot.slane %v2215_v17, 7  ;;  %v186_v22 = vld [vmem:[#allocation7 + $0x10] sm:$0xff]  ;;  %1327 = vmatprep.mubr.f32.mxu1 %v2215_v17  ;;  %v188_v27 = vld [vmem:[#allocation7 + $0x20] sm:$0xff] }
  0x4e   :  { %1674 = vmatprep.subr.bf16.mxu0 %v2205_v7  ;;  %v145_v21 = vrot.slane %v2217_v18, 7  ;;  %v187_v23 = vld [vmem:[#allocation7 + $0x18] sm:$0xff]  ;;  %v2230_v24 = vpack.c.bf16 %v175_v15, %v174_v12  ;;  %v189_v28 = vld [vmem:[#allocation7 + $0x28] sm:$0xff]  ;;  %v176_v29 = vld [vmem:[#allocation5 + $0x40] sm:$0xff]  ;;  %v84_v54 = vadd.s32 16, %v2201_v1  ;;  %v155_v14 = vrot.slane %v2215_v17, 1 }
  0x4f   :  { %vm2220_vm1 = vcmp.gt.s32.totalorder %v90_v10, 0  ;;  %1638 = vmatprep.subr.bf16.mxu1 %v2213_v16  ;;  %v2239_v26 = vpack.c.bf16 %v187_v23, %v186_v22  ;;  %v177_v30 = vld [vmem:[#allocation5 + $0x48] sm:$0xff]  ;;  %v2243_v31 = vpack.c.bf16 %v189_v28, %v188_v27  ;;  %v190_v32 = vld [vmem:[#allocation7 + $0x30] sm:$0xff]  ;;  %v191_v33 = vld [vmem:[#allocation7 + $0x38] sm:$0xff]  ;;  %vm159_vm3 = vcmp.lt.s32.totalorder %v2201_v1, 7 }
  0x50   :  { %1640 = vmatpush3.bf16.msra.mxu1 %v2213_v16  ;;  %v150_v25 = vsel %vm146_vm0, %v145_v21, %v142_v20  ;;  %v2248_v34 = vpack.c.bf16 %v177_v30, %v176_v29  ;;  %v178_v35 = vld [vmem:[#allocation5 + $0x50] sm:$0xff]  ;;  %v179_v36 = vld [vmem:[#allocation5 + $0x58] sm:$0xff]  ;;  %v2252_v37 = vpack.c.bf16 %v191_v33, %v190_v32  ;;  %v192_v38 = vld [vmem:[#allocation7 + $0x40] sm:$0xff]  ;;  %v104_v63 = vand.u32 15, %v84_v54 }
  0x51   :  { %1676 = vmatpush3.bf16.msra.mxu0 %v2205_v7  ;;  %1365 = vmatprep.mubr.msk.f32.mxu0 %vm2220_vm1, %v150_v25  ;;  %v193_v39 = vld [vmem:[#allocation7 + $0x48] sm:$0xff]  ;;  %v2256_v40 = vpack.c.bf16 %v179_v36, %v178_v35  ;;  %v180_v41 = vld [vmem:[#allocation5 + $0x60] sm:$0xff]  ;;  %v194_v44 = vld [vmem:[#allocation7 + $0x50] sm:$0xff] }
  0x52   :  { %1678 = vmatprep.subr.bf16.mxu0 %v2211_v11  ;;  %1642 = vmatprep.subr.bf16.mxu1 %v2239_v26  ;;  %v181_v42 = vld [vmem:[#allocation5 + $0x68] sm:$0xff]  ;;  %v2260_v43 = vpack.c.bf16 %v193_v39, %v192_v38  ;;  %v195_v45 = vld [vmem:[#allocation7 + $0x58] sm:$0xff]  ;;  %v182_v47 = vld [vmem:[#allocation5 + $0x70] sm:$0xff]  ;;  %vm2302_vm2 = vcmp.gt.s32.totalorder %v104_v63, 0 }
  0x53   :  { %v2264_v46 = vpack.c.bf16 %v181_v42, %v180_v41  ;;  %v183_v48 = vld [vmem:[#allocation5 + $0x78] sm:$0xff]  ;;  %v2268_v49 = vpack.c.bf16 %v195_v45, %v194_v44  ;;  %v196_v50 = vld [vmem:[#allocation7 + $0x60] sm:$0xff]  ;;  %v197_v51 = vld [vmem:[#allocation7 + $0x68] sm:$0xff]  ;;  %v83_v44 = vadd.s32 8, %v2201_v1 }
  0x54   :  { %1644 = vmatpush3.bf16.msra.mxu1 %v2239_v26  ;;  %v2272_v52 = vpack.c.bf16 %v183_v48, %v182_v47  ;;  %v2274_v53 = vld [vmem:[#allocation2 + $0x8] sm:$0xff]  ;;  %v370_v55 = vld [vmem:[#allocation8] sm:$0xff]  ;;  %v2279_v57 = vpack.c.bf16 %v197_v51, %v196_v50  ;;  %v2281_v58 = vld [vmem:[#allocation2 + $0x10] sm:$0xff]  ;;  %v85_v50 = vadd.s32 24, %v2201_v1  ;;  %v158_v51 = vrot.slane %v2217_v18, 1 }
  0x55   :  { %1680 = vmatpush3.bf16.msra.mxu0 %v2211_v11  ;;  %1646 = vmatprep.subr.bf16.mxu1 %v2243_v31  ;;  %v371_v56 = vld [vmem:[#allocation8 + $0x8] sm:$0xff]  ;;  %v198_v59 = vld [vmem:[#allocation7 + $0x70] sm:$0xff]  ;;  %v199_v60 = vld [vmem:[#allocation7 + $0x78] sm:$0xff]  ;;  %v143_v61 = vrot.slane %v2274_v53, 7  ;;  %v144_v0 = vrot.slane %v2281_v58, 7  ;;  %v156_v15 = vrot.slane %v2274_v53, 1 }
  0x56   :  { %1682 = vmatprep.subr.bf16.mxu0 %v2230_v24  ;;  %v2286_v62 = vpack.c.bf16 %v371_v56, %v370_v55  ;;  %v372_v2 = vld [vmem:[#allocation8 + $0x10] sm:$0xff]  ;;  %v373_v3 = vld [vmem:[#allocation8 + $0x18] sm:$0xff]  ;;  %v2291_v4 = vpack.c.bf16 %v199_v60, %v198_v59  ;;  %v374_v12 = vld [vmem:[#allocation8 + $0x20] sm:$0xff]  ;;  %v97_v47 = vand.u32 15, %v83_v44  ;;  %v157_v48 = vrot.slane %v2281_v58, 1 }
  0x57   :  { %v149_v6 = vsel %vm146_vm0, %v142_v20, %v143_v61  ;;  %v2299_v8 = vpack.c.bf16 %v373_v3, %v372_v2  ;;  %v148_v10 = vsel %vm146_vm0, %v143_v61, %v144_v0  ;;  %v375_v13 = vld [vmem:[#allocation8 + $0x28] sm:$0xff]  ;;  %v147_v20 = vsel %vm146_vm0, %v144_v0, %v145_v21  ;;  %v376_v23 = vld [vmem:[#allocation8 + $0x30] sm:$0xff]  ;;  %v377_v25 = vld [vmem:[#allocation8 + $0x38] sm:$0xff] }
  0x58   :  { %1648 = vmatpush3.bf16.msra.mxu1 %v2243_v31  ;;  %v2320_v22 = vpack.c.bf16 %v375_v13, %v374_v12  ;;  %v162_v27 = vsel %vm159_vm3, %v155_v14, %v156_v15  ;;  %v2333_v21 = vpack.c.bf16 %v377_v25, %v376_v23  ;;  %v378_v28 = vld [vmem:[#allocation8 + $0x40] sm:$0xff]  ;;  %v379_v29 = vld [vmem:[#allocation8 + $0x48] sm:$0xff]  ;;  %v380_v32 = vld [vmem:[#allocation8 + $0x50] sm:$0xff]  ;;  %vm2372_vm4 = vcmp.lt.s32.totalorder %v97_v47, 15 }
  0x59   :  { %1684 = vmatpush3.bf16.msra.mxu0 %v2230_v24  ;;  %1650 = vmatprep.subr.bf16.mxu1 %v2252_v37  ;;  %v2341_v30 = vpack.c.bf16 %v379_v29, %v378_v28  ;;  %v381_v33 = vld [vmem:[#allocation8 + $0x58] sm:$0xff]  ;;  %v382_v36 = vld [vmem:[#allocation8 + $0x60] sm:$0xff]  ;;  %v383_v38 = vld [vmem:[#allocation8 + $0x68] sm:$0xff]  ;;  %v161_v55 = vsel %vm159_vm3, %v156_v15, %v157_v48  ;;  %v111_v56 = vand.u32 15, %v85_v50  ;;  %v160_v59 = vsel %vm159_vm3, %v157_v48, %v158_v51 }
  0x5a   :  { %1686 = vmatprep.subr.bf16.mxu0 %v2248_v34  ;;  %v2347_v35 = vpack.c.bf16 %v381_v33, %v380_v32  ;;  %v2353_v39 = vpack.c.bf16 %v383_v38, %v382_v36  ;;  %v384_v41 = vld [vmem:[#allocation8 + $0x70] sm:$0xff]  ;;  %v385_v42 = vld [vmem:[#allocation8 + $0x78] sm:$0xff]  ;;  %v163_v61 = vsel %vm159_vm3, %v158_v51, %v155_v14 }
  0x5b   :  { %v2360_v45 = vpack.c.bf16 %v385_v42, %v384_v41  ;;  %vm2387_vm5 = vcmp.lt.s32.totalorder %v111_v56, 15 }
  0x5c   :  { %1652 = vmatpush3.bf16.msra.mxu1 %v2252_v37 }
  0x5d   :  { %1688 = vmatpush3.bf16.msra.mxu0 %v2248_v34  ;;  %1654 = vmatprep.subr.bf16.mxu1 %v2260_v43 }
  0x5e   :  { %1690 = vmatprep.subr.bf16.mxu0 %v2256_v40 }
  0x60   :  { %1656 = vmatpush3.bf16.msra.mxu1 %v2260_v43 }
  0x61   :  { %1692 = vmatpush3.bf16.msra.mxu0 %v2256_v40  ;;  %1658 = vmatprep.subr.bf16.mxu1 %v2268_v49 }
  0x62   :  { %1694 = vmatprep.subr.bf16.mxu0 %v2264_v46 }
  0x64   :  { %1660 = vmatpush3.bf16.msra.mxu1 %v2268_v49 }
  0x65   :  { %1696 = vmatpush3.bf16.msra.mxu0 %v2264_v46  ;;  %1662 = vmatprep.subr.bf16.mxu1 %v2279_v57 }
  0x66   :  { %1698 = vmatprep.subr.bf16.mxu0 %v2272_v52 }
  0x68   :  { %1664 = vmatpush3.bf16.msra.mxu1 %v2279_v57 }
  0x69   :  { %1700 = vmatpush3.bf16.msra.mxu0 %v2272_v52  ;;  %1666 = vmatprep.subr.bf16.mxu1 %v2291_v4 }
  0x6a   :  { %1702 = vmatprep.subr.bf16.mxu0 %v2286_v62 }
  0x6c   :  { %1366 = vmatmul.mubr.f32.vlgmr.msra.gmra.mrb[0].mxu0 %v149_v6  ;;  %1668 = vmatpush3.bf16.msra.mxu1 %v2291_v4 }
  0x6d   :  { %1704 = vmatpush3.bf16.msra.mxu0 %v2286_v62  ;;  %1368 = vmatprep.mubr.msk.f32.mxu0 %vm2302_vm2, %v148_v10 }
  0x6e   :  { %1706 = vmatprep.subr.bf16.mxu0 %v2299_v8  ;;  %1734 = vmatprep.subr.bf16.mxu1 %v2213_v16 }
  0x6f   :  { %1328 = vmatmul.mubr.f32.vlgmr.msra.gmra.mrb[0].mxu1 %v2274_v53 }
  0x70   :  { %1369 = vmatmul.mubr.f32.gmra.mrb[2].mxu0 %v147_v20  ;;  %1330 = vmatprep.mubr.f32.mxu1 %v2281_v58 }
  0x71   :  { %1708 = vmatpush3.bf16.msra.mxu0 %v2299_v8  ;;  %1403 = vmatprep.mubr.f32.mxu0 %v162_v27 }
  0x72   :  { %1710 = vmatprep.subr.bf16.mxu0 %v2320_v22  ;;  %1736 = vmatpush3.bf16.msra.mxu1 %v2213_v16 }
  0x73   :  { %1738 = vmatprep.subr.bf16.mxu1 %v2239_v26  ;;  %1331 = vmatmul.mubr.f32.gmra.mrb[2].mxu1 %v2217_v18 }
  0x75   :  { %1712 = vmatpush3.bf16.msra.mxu0 %v2320_v22 }
  0x76   :  { %1714 = vmatprep.subr.bf16.mxu0 %v2333_v21  ;;  %1740 = vmatpush3.bf16.msra.mxu1 %v2239_v26 }
  0x77   :  { %1742 = vmatprep.subr.bf16.mxu1 %v2243_v31 }
  0x79   :  { %1716 = vmatpush3.bf16.msra.mxu0 %v2333_v21 }
  0x7a   :  { %1718 = vmatprep.subr.bf16.mxu0 %v2341_v30  ;;  %1744 = vmatpush3.bf16.msra.mxu1 %v2243_v31 }
  0x7b   :  { %1746 = vmatprep.subr.bf16.mxu1 %v2252_v37 }
  0x7d   :  { %1720 = vmatpush3.bf16.msra.mxu0 %v2341_v30 }
  0x7e   :  { %1722 = vmatprep.subr.bf16.mxu0 %v2347_v35  ;;  %1748 = vmatpush3.bf16.msra.mxu1 %v2252_v37 }
  0x7f   :  { %1750 = vmatprep.subr.bf16.mxu1 %v2260_v43 }
  0x81   :  { %1724 = vmatpush3.bf16.msra.mxu0 %v2347_v35 }
  0x82   :  { %1726 = vmatprep.subr.bf16.mxu0 %v2353_v39  ;;  %1752 = vmatpush3.bf16.msra.mxu1 %v2260_v43 }
  0x83   :  { %1754 = vmatprep.subr.bf16.mxu1 %v2268_v49 }
  0x85   :  { %1728 = vmatpush3.bf16.msra.mxu0 %v2353_v39 }
  0x86   :  { %1730 = vmatprep.subr.bf16.mxu0 %v2360_v45  ;;  %1756 = vmatpush3.bf16.msra.mxu1 %v2268_v49 }
  0x87   :  { %1758 = vmatprep.subr.bf16.mxu1 %v2279_v57 }
  0x89   :  { %1732 = vmatpush3.bf16.msra.mxu0 %v2360_v45 }
  0x8a   :  { %1830 = vmatprep.subr.bf16.mxu0 %v2213_v16  ;;  %1760 = vmatpush3.bf16.msra.mxu1 %v2279_v57 }
  0x8b   :  { %1762 = vmatprep.subr.bf16.mxu1 %v2291_v4 }
  0x8c   :  { %1404 = vmatmul.mubr.msk.f32.vlgmr.msra.gmra.mrb[0].mxu0 %vm2372_vm4, %v161_v55 }
  0x8d   :  { %1406 = vmatprep.mubr.f32.mxu0 %v160_v59  ;;  %1832 = vmatpush3.bf16.msra.mxu0 %v2213_v16 }
  0x8e   :  { %1834 = vmatprep.subr.bf16.mxu0 %v2239_v26  ;;  %1764 = vmatpush3.bf16.msra.mxu1 %v2291_v4 }
  0x8f   :  { %1766 = vmatprep.subr.bf16.mxu1 %v2203_v5 }
  0x90   :  { %1407 = vmatmul.mubr.msk.f32.gmra.mrb[2].mxu0 %vm2387_vm5, %v163_v61 }
  0x91   :  { %1836 = vmatpush3.bf16.msra.mxu0 %v2239_v26 }
  0x92   :  { %1838 = vmatprep.subr.bf16.mxu0 %v2243_v31 }
  0x95   :  { %1840 = vmatpush3.bf16.msra.mxu0 %v2243_v31 }
  0x96   :  { %1842 = vmatprep.subr.bf16.mxu0 %v2252_v37 }
  0x99   :  { %1844 = vmatpush3.bf16.msra.mxu0 %v2252_v37 }
  0x9a   :  { %1846 = vmatprep.subr.bf16.mxu0 %v2260_v43 }
  0x9d   :  { %1848 = vmatpush3.bf16.msra.mxu0 %v2260_v43  ;;  %v2418_v43 = vld [vmem:[%s2585_s4] ss:$0 sm:$0xff]  ;;  %s2096_s4 = smov [#allocation10]  }
  0x9e   :  { %1850 = vmatprep.subr.bf16.mxu0 %v2268_v49  ;;  %s1088_s17 = sshll.u32 %s2096_s4, 4  ;;  %s1089_s17 = int_to_ptr.vmem [resolvable:$true] %s1088_s17 }
  0x9f   :  { %s2060_s18 = scalar_lea.vmem %s1089_s17, 512  ;;  %p2065_p5 = scmp.lt.s32.totalorder %s1089_s17, %s1089_s17 }
  0xa0   :  { %p2061_p4 = scmp.ne.s32.totalorder %s1089_s17, %s2060_s18  ;;  %p2066_p6 = scmp.lt.s32.totalorder %s2060_s18, %s2060_s18 }
  0xa1   :  { %1852 = vmatpush3.bf16.msra.mxu0 %v2268_v49 }
  0xa2   :  { %1854 = vmatprep.subr.bf16.mxu0 %v2279_v57  ;;  %p2067_p7 = por %p2066_p6, %p2065_p5 }
  0xa4   :  { %p2068_p8 = pnand %p2067_p7, %p2061_p4 }
  0xa5   :  { %1856 = vmatpush3.bf16.msra.mxu0 %v2279_v57 }
  0xa6   :  { %1858 = vmatprep.subr.bf16.mxu0 %v2291_v4 }
  0xa9   :  { %1860 = vmatpush3.bf16.msra.mxu0 %v2291_v4 }
  0xaa   :  { %1862 = vmatprep.subr.bf16.mxu0 %v2203_v5 }
 0x142   :  { %v1329_v16 = vpop.f32.mrb[0].mxu1 }
 0x143   :  { %v266_v26 = vpop.f32.mrb[1].mxu1 }
 0x146   :  { %v1332_v31 = vpop.f32.mrb[2].mxu1 }
 0x147   :  { %v276_v37 = vpop.f32.mrb[3].mxu1 }
 0x15f   :  { %v1405_v49 = vpop.f32.mrb[0].mxu0 }
 0x160   :  { %v1941_v63 = vadd.f32 %v1405_v49, %v1329_v16  ;;  %v452_v0 = vpop.f32.mrb[1].mxu0 }
 0x161   :  { %v1942_v2 = vadd.f32 %v452_v0, %v266_v26 }
 0x162   :  { %v482_v57 = vadd.f32 %v1941_v63, %v2418_v43 }
 0x163   :  { %v481_v3 = vadd.f32 %v1942_v2, %v2418_v43  ;;  %v1408_v4 = vpop.f32.mrb[2].mxu0 }
 0x164   :  { %v486_v6 = vmax.f32 %v482_v57, 0.0  ;;  %v1943_v10 = vadd.f32 %v1408_v4, %v1332_v31  ;;  %v462_v12 = vpop.f32.mrb[3].mxu0 }
 0x165   :  { %v485_v13 = vmax.f32 %v481_v3, 0.0  ;;  %v1944_v14 = vadd.f32 %v462_v12, %v276_v37 }
 0x166   :  { %v490_v15 = vadd.f32 %v486_v6, %v2274_v53  ;;  %v484_v20 = vadd.f32 %v1943_v10, %v2418_v43 }
 0x167   :  { %v483_v23 = vadd.f32 %v1944_v14, %v2418_v43  ;;  %v489_v25 = vadd.f32 %v485_v13, %v2215_v17 }
 0x168   :  { %v494_v27 = vrot.slane %v490_v15, 7  ;;  %v488_v28 = vmax.f32 %v484_v20, 0.0  ;;  %v506_v29 = vrot.slane %v490_v15, 1 }
 0x169   :  { %v487_v32 = vmax.f32 %v483_v23, 0.0  ;;  %1441 = vmatprep.mubr.f32.mxu1 %v489_v25  ;;  %v493_v33 = vrot.slane %v489_v25, 7  ;;  %v505_v36 = vrot.slane %v489_v25, 1 }
 0x16a   :  { %1442 = vmatmul.mubr.f32.vlgmr.msra.gmra.mrb[4].mxu1 %v490_v15  ;;  %v492_v38 = vadd.f32 %v488_v28, %v2217_v18 }
 0x16b   :  { %1768 = vmatpush3.bf16.msra.mxu1 %v2203_v5  ;;  %v491_v41 = vadd.f32 %v487_v32, %v2281_v58  ;;  %v499_v42 = vsel %vm146_vm0, %v493_v33, %v494_v27  ;;  %v511_v44 = vsel %vm159_vm3, %v505_v36, %v506_v29 }
 0x16c   :  { %1770 = vmatprep.subr.bf16.mxu1 %v2205_v7  ;;  %v496_v47 = vrot.slane %v492_v38, 7  ;;  %v508_v48 = vrot.slane %v492_v38, 1 }
 0x16d   :  { %v507_v50 = vrot.slane %v491_v41, 1  ;;  %1444 = vmatprep.mubr.f32.mxu1 %v491_v41  ;;  %v495_v51 = vrot.slane %v491_v41, 7 }
 0x16e   :  { %1445 = vmatmul.mubr.f32.gmra.mrb[6].mxu1 %v492_v38  ;;  %v500_v55 = vsel %vm146_vm0, %v496_v47, %v493_v33  ;;  %v512_v56 = vsel %vm159_vm3, %v508_v48, %v505_v36 }
 0x16f   :  { %1772 = vmatpush3.bf16.msra.mxu1 %v2205_v7  ;;  %1479 = vmatprep.mubr.msk.f32.mxu1 %vm2220_vm1, %v500_v55  ;;  %v498_v59 = vsel %vm146_vm0, %v494_v27, %v495_v51  ;;  %v497_v61 = vsel %vm146_vm0, %v495_v51, %v496_v47  ;;  %v510_v16 = vsel %vm159_vm3, %v506_v29, %v507_v50 }
 0x170   :  { %1774 = vmatprep.subr.bf16.mxu1 %v2211_v11  ;;  %v509_v26 = vsel %vm159_vm3, %v507_v50, %v508_v48 }
 0x173   :  { %1776 = vmatpush3.bf16.msra.mxu1 %v2211_v11 }
 0x174   :  { %1778 = vmatprep.subr.bf16.mxu1 %v2230_v24 }
 0x177   :  { %1780 = vmatpush3.bf16.msra.mxu1 %v2230_v24 }
 0x178   :  { %1782 = vmatprep.subr.bf16.mxu1 %v2248_v34 }
 0x17b   :  { %1784 = vmatpush3.bf16.msra.mxu1 %v2248_v34 }
 0x17c   :  { %1786 = vmatprep.subr.bf16.mxu1 %v2256_v40 }
 0x17f   :  { %1788 = vmatpush3.bf16.msra.mxu1 %v2256_v40 }
 0x180   :  { %1790 = vmatprep.subr.bf16.mxu1 %v2264_v46 }
 0x183   :  { %1792 = vmatpush3.bf16.msra.mxu1 %v2264_v46 }
 0x184   :  { %1794 = vmatprep.subr.bf16.mxu1 %v2272_v52 }
 0x187   :  { %1796 = vmatpush3.bf16.msra.mxu1 %v2272_v52 }
 0x188   :  { %1798 = vmatprep.subr.bf16.mxu1 %v2286_v62 }
 0x18a   :  { %1480 = vmatmul.mubr.f32.vlgmr.msra.gmra.mrb[4].mxu1 %v499_v42 }
 0x18b   :  { %1482 = vmatprep.mubr.msk.f32.mxu1 %vm2302_vm2, %v498_v59  ;;  %1800 = vmatpush3.bf16.msra.mxu1 %v2286_v62 }
 0x18c   :  { %1802 = vmatprep.subr.bf16.mxu1 %v2299_v8 }
 0x18e   :  { %1483 = vmatmul.mubr.f32.gmra.mrb[6].mxu1 %v497_v61 }
 0x18f   :  { %1804 = vmatpush3.bf16.msra.mxu1 %v2299_v8  ;;  %1517 = vmatprep.mubr.f32.mxu1 %v511_v44 }
 0x190   :  { %1806 = vmatprep.subr.bf16.mxu1 %v2320_v22 }
 0x193   :  { %1808 = vmatpush3.bf16.msra.mxu1 %v2320_v22 }
 0x194   :  { %1810 = vmatprep.subr.bf16.mxu1 %v2333_v21 }
 0x197   :  { %1812 = vmatpush3.bf16.msra.mxu1 %v2333_v21 }
 0x198   :  { %1814 = vmatprep.subr.bf16.mxu1 %v2341_v30 }
 0x19b   :  { %1816 = vmatpush3.bf16.msra.mxu1 %v2341_v30 }
 0x19c   :  { %1818 = vmatprep.subr.bf16.mxu1 %v2347_v35 }
 0x19f   :  { %1820 = vmatpush3.bf16.msra.mxu1 %v2347_v35 }
 0x1a0   :  { %1822 = vmatprep.subr.bf16.mxu1 %v2353_v39 }
 0x1a3   :  { %1824 = vmatpush3.bf16.msra.mxu1 %v2353_v39 }
 0x1a4   :  { %1826 = vmatprep.subr.bf16.mxu1 %v2360_v45 }
 0x1a7   :  { %1828 = vmatpush3.bf16.msra.mxu1 %v2360_v45 }
 0x1a8   :  { %1925 = vmatprep.subr.bf16.mxu1 %v2286_v62 }
 0x1aa   :  { %1518 = vmatmul.mubr.msk.f32.vlgmr.msra.gmra.mrb[4].mxu1 %vm2372_vm4, %v510_v16 }
 0x1ab   :  { %1520 = vmatprep.mubr.f32.mxu1 %v509_v26  ;;  %1933 = vmatpush3.bf16.msra.mxu1 %v2286_v62 }
 0x1ac   :  { %1926 = vmatprep.subr.bf16.mxu1 %v2299_v8 }
 0x1ae   :  { %1521 = vmatmul.mubr.msk.f32.gmra.mrb[6].mxu1 %vm2387_vm5, %v512_v56 }
 0x1af   :  { %1934 = vmatpush3.bf16.msra.mxu1 %v2299_v8 }
 0x1b0   :  { %1927 = vmatprep.subr.bf16.mxu1 %v2320_v22 }
 0x1b3   :  { %1935 = vmatpush3.bf16.msra.mxu1 %v2320_v22 }
 0x1b4   :  { %1928 = vmatprep.subr.bf16.mxu1 %v2333_v21 }
 0x1b7   :  { %1936 = vmatpush3.bf16.msra.mxu1 %v2333_v21 }
 0x1b8   :  { %1929 = vmatprep.subr.bf16.mxu1 %v2341_v30 }
 0x1bb   :  { %1937 = vmatpush3.bf16.msra.mxu1 %v2341_v30 }
 0x1bc   :  { %1930 = vmatprep.subr.bf16.mxu1 %v2347_v35 }
 0x1bf   :  { %1938 = vmatpush3.bf16.msra.mxu1 %v2347_v35 }
 0x1c0   :  { %1931 = vmatprep.subr.bf16.mxu1 %v2353_v39 }
 0x1c3   :  { %1939 = vmatpush3.bf16.msra.mxu1 %v2353_v39 }
 0x1c4   :  { %1932 = vmatprep.subr.bf16.mxu1 %v2360_v45 }
 0x1c7   :  { %1940 = vmatpush3.bf16.msra.mxu1 %v2360_v45 }
 0x27d   :  { %v1519_v31 = vpop.f32.mrb[4].mxu1 }
 0x27e   :  { %v777_v37 = vadd.f32 %v1519_v31, %v2418_v43  ;;  %v753_v49 = vpop.f32.mrb[5].mxu1 }
 0x27f   :  { %v776_v63 = vadd.f32 %v2418_v43, %v753_v49 }
 0x280   :  { %v781_v0 = vmax.f32 %v777_v37, 0.0 }
 0x281   :  { %v780_v2 = vmax.f32 %v776_v63, 0.0  ;;  %v1522_v57 = vpop.f32.mrb[6].mxu1 }
 0x282   :  { %v785_v3 = vadd.f32 %v781_v0, %v2274_v53  ;;  %v779_v4 = vadd.f32 %v1522_v57, %v2418_v43  ;;  %v763_v6 = vpop.f32.mrb[7].mxu1 }
 0x283   :  { %v784_v10 = vadd.f32 %v780_v2, %v2215_v17  ;;  %v778_v12 = vadd.f32 %v2418_v43, %v763_v6 }
 0x284   :  { %v789_v13 = vrot.slane %v785_v3, 7  ;;  %v783_v14 = vmax.f32 %v779_v4, 0.0  ;;  %v801_v15 = vrot.slane %v785_v3, 1 }
 0x285   :  { %v788_v20 = vrot.slane %v784_v10, 7  ;;  %v800_v23 = vrot.slane %v784_v10, 1  ;;  %v782_v25 = vmax.f32 %v778_v12, 0.0  ;;  %1555 = vmatprep.mubr.f32.mxu0 %v784_v10 }
 0x286   :  { %v787_v27 = vadd.f32 %v783_v14, %v2217_v18  ;;  %1556 = vmatmul.mubr.f32.vlgmr.msra.gmra.mrb[4].mxu0 %v785_v3 }
 0x287   :  { %v786_v28 = vadd.f32 %v782_v25, %v2281_v58  ;;  %1864 = vmatpush3.bf16.msra.mxu0 %v2203_v5  ;;  %v794_v53 = vsel %vm146_vm0, %v788_v20, %v789_v13  ;;  %v806_v17 = vsel %vm159_vm3, %v800_v23, %v801_v15 }
 0x288   :  { %v791_v29 = vrot.slane %v787_v27, 7  ;;  %1866 = vmatprep.subr.bf16.mxu0 %v2205_v7  ;;  %v803_v32 = vrot.slane %v787_v27, 1 }
 0x289   :  { %v790_v33 = vrot.slane %v786_v28, 7  ;;  %1558 = vmatprep.mubr.f32.mxu0 %v786_v28  ;;  %v802_v36 = vrot.slane %v786_v28, 1 }
 0x28a   :  { %1559 = vmatmul.mubr.f32.gmra.mrb[6].mxu0 %v787_v27  ;;  %v795_v18 = vsel %vm146_vm0, %v791_v29, %v788_v20  ;;  %v807_v5 = vsel %vm159_vm3, %v803_v32, %v800_v23 }
 0x28b   :  { %1868 = vmatpush3.bf16.msra.mxu0 %v2205_v7  ;;  %1593 = vmatprep.mubr.msk.f32.mxu0 %vm2220_vm1, %v795_v18  ;;  %v804_v58 = vsel %vm159_vm3, %v802_v36, %v803_v32  ;;  %v793_v38 = vsel %vm146_vm0, %v789_v13, %v790_v33  ;;  %v792_v41 = vsel %vm146_vm0, %v790_v33, %v791_v29 }
 0x28c   :  { %1634 = vmatprep.mubr.f32.mxu1 %v804_v58  ;;  %1870 = vmatprep.subr.bf16.mxu0 %v2211_v11  ;;  %v805_v42 = vsel %vm159_vm3, %v801_v15, %v802_v36 }
 0x28d   :  { %1635 = vmatmul.mubr.msk.f32.vlgmr.msra.gmra.mrb[8].mxu1 %vm2387_vm5, %v807_v5 }
 0x28f   :  { %1872 = vmatpush3.bf16.msra.mxu0 %v2211_v11 }
 0x290   :  { %1874 = vmatprep.subr.bf16.mxu0 %v2230_v24 }
 0x293   :  { %1876 = vmatpush3.bf16.msra.mxu0 %v2230_v24 }
 0x294   :  { %1878 = vmatprep.subr.bf16.mxu0 %v2248_v34 }
 0x297   :  { %1880 = vmatpush3.bf16.msra.mxu0 %v2248_v34 }
 0x298   :  { %1882 = vmatprep.subr.bf16.mxu0 %v2256_v40 }
 0x29b   :  { %1884 = vmatpush3.bf16.msra.mxu0 %v2256_v40 }
 0x29c   :  { %1886 = vmatprep.subr.bf16.mxu0 %v2264_v46 }
 0x29f   :  { %1888 = vmatpush3.bf16.msra.mxu0 %v2264_v46 }
 0x2a0   :  { %1890 = vmatprep.subr.bf16.mxu0 %v2272_v52 }
 0x2a3   :  { %1892 = vmatpush3.bf16.msra.mxu0 %v2272_v52 }
 0x2a4   :  { %1894 = vmatprep.subr.bf16.mxu0 %v2286_v62 }
 0x2a6   :  { %1594 = vmatmul.mubr.f32.vlgmr.msra.gmra.mrb[4].mxu0 %v794_v53 }
 0x2a7   :  { %1596 = vmatprep.mubr.msk.f32.mxu0 %vm2302_vm2, %v793_v38  ;;  %1896 = vmatpush3.bf16.msra.mxu0 %v2286_v62 }
 0x2a8   :  { %1898 = vmatprep.subr.bf16.mxu0 %v2299_v8 }
 0x2aa   :  { %1597 = vmatmul.mubr.f32.gmra.mrb[6].mxu0 %v792_v41 }
 0x2ab   :  { %1900 = vmatpush3.bf16.msra.mxu0 %v2299_v8  ;;  %1631 = vmatprep.mubr.f32.mxu0 %v806_v17 }
 0x2ac   :  { %1902 = vmatprep.subr.bf16.mxu0 %v2320_v22 }
 0x2af   :  { %1904 = vmatpush3.bf16.msra.mxu0 %v2320_v22 }
 0x2b0   :  { %1906 = vmatprep.subr.bf16.mxu0 %v2333_v21 }
 0x2b3   :  { %1908 = vmatpush3.bf16.msra.mxu0 %v2333_v21 }
 0x2b4   :  { %1910 = vmatprep.subr.bf16.mxu0 %v2341_v30 }
 0x2b7   :  { %1912 = vmatpush3.bf16.msra.mxu0 %v2341_v30 }
 0x2b8   :  { %1914 = vmatprep.subr.bf16.mxu0 %v2347_v35 }
 0x2bb   :  { %1916 = vmatpush3.bf16.msra.mxu0 %v2347_v35 }
 0x2bc   :  { %1918 = vmatprep.subr.bf16.mxu0 %v2353_v39 }
 0x2bf   :  { %1920 = vmatpush3.bf16.msra.mxu0 %v2353_v39 }
 0x2c0   :  { %1922 = vmatprep.subr.bf16.mxu0 %v2360_v45 }
 0x2c3   :  { %1924 = vmatpush3.bf16.msra.mxu0 %v2360_v45 }
 0x2c6   :  { %1632 = vmatmul.mubr.msk.f32.vlgmr.msra.gmra.mrb[4].mxu0 %vm2372_vm4, %v805_v42 }
 0x360   :  { %v1636_v1 = vpop.f32.mrb[8].mxu1 }
 0x361   :  { %v1058_v7 = vpop.f32.mrb[9].mxu1 }
 0x37d   :  { %v1598_v11 = vpop.f32.mrb[6].mxu0 }
 0x37e   :  { %v1945_v19 = vadd.f32 %v1636_v1, %v1598_v11  ;;  %v973_v24 = vpop.f32.mrb[7].mxu0 }
 0x37f   :  { %v1946_v34 = vadd.f32 %v1058_v7, %v973_v24 }
 0x380   :  { %v1074_v40 = vadd.f32 %v1945_v19, %v2418_v43 }
 0x381   :  { %v1073_v46 = vadd.f32 %v1946_v34, %v2418_v43 }
 0x382   :  { %v1078_v52 = vmax.f32 %v1074_v40, 0.0 }
 0x383   :  { %v1077_v62 = vmax.f32 %v1073_v46, 0.0 }
 0x384   :  { %1082 = vst [vmem:[#allocation10 + $0x18] sm:$0xff] %v1078_v52 }
 0x385   :  { %1081 = vst [vmem:[#allocation10 + $0x10] sm:$0xff] %v1077_v62 }
 0x399   :  { %v1633_v8 = vpop.f32.mrb[4].mxu0 }
 0x39a   :  { %v1072_v9 = vadd.f32 %v1633_v8, %v2418_v43  ;;  %v1048_v22 = vpop.f32.mrb[5].mxu0 }
 0x39b   :  { %v1071_v21 = vadd.f32 %v2418_v43, %v1048_v22 }
 0x39c   :  { %v1076_v30 = vmax.f32 %v1072_v9, 0.0 }
 0x39d   :  { %v1075_v35 = vmax.f32 %v1071_v21, 0.0 }
 0x39e   :  { %1080 = vst [vmem:[#allocation10 + $0x8] sm:$0xff] %v1076_v30 }
 0x39f   :  { %1079 = vst [vmem:[#allocation10] sm:$0xff] %v1075_v35 }
 0x3a0   :  { %2071 = shalt.err (!%p2068_p8)
}
 0x3a1   :  { %s2072_s22 = scalar_lea.hbm %s2586_s5, 512 }
 0x3a2   :  { %p2073_p9 = scmp.ne.s32.totalorder %s2586_s5, %s2072_s22  ;;  %p2076_p10 = scmp.lt.u32.totalorder %s2072_s22, %s2586_s5 }
 0x3a4   :  { %p2078_p11 = pnand %p2076_p10, %p2073_p9 }
 0x3a6   :  { %2081 = shalt.err (!%p2078_p11)
}
 0x3a7   :  { %1094 = dma.vmem_to_hbm [thread:$0]  %s1089_s17, 512, %s2586_s5, [#allocation4], %s2092_s30, %s2092_s30, %s2093_s6  }
 0x3a8   :  { %2088 = dma.done.wait [#allocation4], 512  }
 0x3a9   :  { %2089 = vsyncadd [#allocation4], 4294966784 }
 0x3aa   :  { %1098 = vsyncpa [#allocation3], 1 }
 0x3ab   :  { %1099 = vsyncpa [#allocation6], 1 }
 0x3ac   :  { %1100 = vsyncpa [#allocation9], 1 }
 0x3ad   :  { %1101 = vsyncpa [#allocation4], 1 }

</bundles_post_ra>
